<compile_context>
chip_gen: v5e
topology: v5e:2x2
jax: 0.10.0
libtpu: 0.0.40
codegen_flags: <defaults>
</compile_context>

<pallas_src>
import numpy as np

import jax
import jax.numpy as jnp
from jax.experimental import pallas as pl
from jax.experimental.pallas import tpu as pltpu


# ----------------------------------------------------------------------------
# Fused kernel factory: upsample+pad(x1) -> concat(x2,x1) -> (conv+BN+ReLU)x2
# ----------------------------------------------------------------------------
def _make_up_kernel(has_x2, b_blk, h_out):
    """Kernel over one batch block.

    Activations use a lane-dense row-flat NHWC layout (rows of length W*C).
    Each 3x3 conv is 3 MXU matmuls against banded row operators (dx taps and
    the W zero-padding folded into the operator at trace time); dy taps are
    one-row shifts of the merged (B_blk*H, W*C) rows, masked at per-image
    boundaries.  Channel concat is fused: conv1 accumulates the x2 group and
    the upsampled-x1 group into the same f32 accumulator.
    """
    f32, bf16 = jnp.float32, jnp.bfloat16
    m = b_blk * h_out

    def kernel(*refs):
        if has_x2:
            (x1_ref, x2_ref, uh_ref, t1a_ref, t1bf_ref,
             s1_ref, b1_ref, t2_ref, s2_ref, b2_ref, o_ref) = refs
        else:
            (x1_ref, uh_ref, t1bf_ref,
             s1_ref, b1_ref, t2_ref, s2_ref, b2_ref, o_ref) = refs

        # Per-image boundary masks for the dy row shifts over the merged rows:
        # they implement the conv's zero padding along H and stop shifts from
        # leaking across the B_blk images packed into this block.
        row = jax.lax.broadcasted_iota(jnp.int32, (m, 1), 0)
        m_dn = (row % h_out) != 0             # row h reads x[h-1]
        m_up = (row % h_out) != (h_out - 1)   # row h reads x[h+1]

        def conv_rows(x, t_ref):
            # 3x3 conv, padding=1: (M, W*Cin) -> (M, W*Cout) f32 accumulator.
            zrow = jnp.zeros((1, x.shape[1]), x.dtype)
            x_dn = jnp.where(m_dn, jnp.concatenate([zrow, x[:m - 1]], axis=0), 0.0)
            x_up = jnp.where(m_up, jnp.concatenate([x[1:], zrow], axis=0), 0.0)
            acc = jnp.dot(x_dn, t_ref[0], preferred_element_type=f32)
            acc += jnp.dot(x, t_ref[1], preferred_element_type=f32)
            acc += jnp.dot(x_up, t_ref[2], preferred_element_type=f32)
            return acc

        # Bilinear x2 upsample along H (plus the module's F.pad) as one small
        # batched matmul; the column upsample/pad operator is already folded
        # into t1bf at trace time, so no W-upsample matmul or extra bf16
        # rounding is needed in the kernel.
        x1 = x1_ref[...]                                          # (B, H1, W1*C1)
        uh = uh_ref[...]
        uh_b = jnp.broadcast_to(uh, (b_blk,) + uh.shape)
        t = jnp.einsum("boh,bhk->bok", uh_b, x1,
                       preferred_element_type=f32)                # (B, H, W1*C1)
        t = t.astype(bf16).reshape(m, x1.shape[-1])               # merged rows

        # conv1 over concat([x2, upsampled x1], channels); concat never built.
        acc1 = conv_rows(t, t1bf_ref)
        if has_x2:
            x2 = x2_ref[...].reshape(m, -1)                       # (M, W*C2)
            acc1 += conv_rows(x2, t1a_ref)
        y1 = jnp.maximum(acc1 * s1_ref[...] + b1_ref[...], 0.0)   # BN1 + ReLU
        y1 = y1.astype(bf16)

        acc2 = conv_rows(y1, t2_ref)
        y2 = jnp.maximum(acc2 * s2_ref[...] + b2_ref[...], 0.0)   # BN2 + ReLU
        o_ref[...] = y2.astype(o_ref.dtype).reshape(b_blk, h_out, y2.shape[-1])

    return kernel


# ----------------------------------------------------------------------------
# Trace-time operator construction
# ----------------------------------------------------------------------------
def _upsample_matrix(out_size, in_size):
    """(out_size, in_size) bilinear interpolation matrix, align_corners=True."""
    u = np.zeros((out_size, in_size), np.float32)
    if in_size == 1 or out_size == 1:
        u[:, 0] = 1.0
        return u
    scale = (in_size - 1) / (out_size - 1)
    for i in range(out_size):
        src = i * scale
        i0 = min(int(np.floor(src)), in_size - 2)
        f = src - i0
        u[i, i0] += 1.0 - f
        u[i, i0 + 1] += f
    return u


def _conv_row_operators(w_hwio, width):
    """(3,3,Cin,Cout) conv weights -> (3, width*Cin, width*Cout) banded row
    operators T with T[dy, wi*Cin+ci, wo*Cout+co] = w[dy, wi-wo+1, ci, co]
    (zero outside the 3-tap band == zero padding along W)."""
    kh, kw, cin, cout = w_hwio.shape
    wi = np.arange(width)[:, None]
    wo = np.arange(width)[None, :]
    dx = wi - wo + 1
    valid = jnp.asarray((dx >= 0) & (dx <= kw - 1))
    dxc = np.clip(dx, 0, kw - 1)
    blocks = w_hwio[:, dxc]                                  # (3, W, W, Cin, Cout)
    blocks = jnp.where(valid[None, :, :, None, None], blocks, 0.0)
    return jnp.transpose(blocks, (0, 1, 3, 2, 4)).reshape(
        kh, width * cin, width * cout)


def fold_bn(conv_b, gamma, beta, running_mean, running_var, eps=1e-5):
    inv_std = 1.0 / jnp.sqrt(running_var + eps)
    scale = gamma * inv_std
    bias = (conv_b - running_mean) * scale + beta
    return scale, bias


def _pick_batch_block(n, h_out):
    """Images per grid step.  Targets ~256 merged rows (B_blk*H) so the conv
    matmuls fill the 256-wide MXU on v6e/v7x (>=128 already saturates v5e);
    for larger n this still leaves >=2 grid steps so v7x's two TensorCores
    both get work through the 'parallel' batch axis."""
    target_rows = 256
    b = max(1, min(n, max(1, target_rows // max(h_out, 1))))
    while n % b:
        b -= 1
    return b


# ----------------------------------------------------------------------------
# Up module forward
# ----------------------------------------------------------------------------
def init_up_params(key, in_ch, out_ch):
    ks = jax.random.split(key, 12)
    p = {}
    # DoubleConv: conv1 (in_ch -> out_ch), conv2 (out_ch -> out_ch), HWIO.
    p["w1"] = jax.random.normal(ks[0], (3, 3, in_ch, out_ch), jnp.float32) * 0.1
    p["b1"] = jax.random.normal(ks[1], (out_ch,), jnp.float32) * 0.1
    p["g1"] = 1.0 + 0.1 * jax.random.normal(ks[2], (out_ch,), jnp.float32)
    p["be1"] = 0.1 * jax.random.normal(ks[3], (out_ch,), jnp.float32)
    p["w2"] = jax.random.normal(ks[4], (3, 3, out_ch, out_ch), jnp.float32) * 0.1
    p["b2"] = jax.random.normal(ks[5], (out_ch,), jnp.float32) * 0.1
    p["g2"] = 1.0 + 0.1 * jax.random.normal(ks[6], (out_ch,), jnp.float32)
    p["be2"] = 0.1 * jax.random.normal(ks[7], (out_ch,), jnp.float32)
    # BN running stats (eval mode) - non-trivial so the BN fold is exercised.
    p["rm1"] = 0.1 * jax.random.normal(ks[8], (out_ch,), jnp.float32)
    p["rv1"] = 0.8 + 0.4 * jax.random.uniform(ks[9], (out_ch,), jnp.float32)
    p["rm2"] = 0.1 * jax.random.normal(ks[10], (out_ch,), jnp.float32)
    p["rv2"] = 0.8 + 0.4 * jax.random.uniform(ks[11], (out_ch,), jnp.float32)
    return p


@jax.jit
def up_forward(params, x1_nchw, x2_nchw=None):
    """Up.forward: bilinear x2 upsample of x1, pad to x2, concat, DoubleConv."""
    n, c1, h_in, w_in = x1_nchw.shape
    # NCHW -> row-flat NHWC; one relayout pass at the module boundary.
    x1 = jnp.transpose(x1_nchw, (0, 2, 3, 1)).reshape(n, h_in, w_in * c1)
    h_up, w_up = 2 * h_in, 2 * w_in

    w1, w2 = params["w1"], params["w2"]
    cin1, cout = w1.shape[2], w1.shape[3]

    has_x2 = x2_nchw is not None
    if has_x2:
        _, c2, h_out, w_out = x2_nchw.shape
        x2 = jnp.transpose(x2_nchw, (0, 2, 3, 1)).reshape(n, h_out, w_out * c2)
        # Replicate the module's F.pad argument order exactly:
        # diff_x (H-size diff) pads W, diff_y (W-size diff) pads H.  The torch
        # module only reaches the concat when both diffs agree; mirror that.
        diff_x = h_out - h_up
        diff_y = w_out - w_up
        pad_w_lo = diff_x // 2
        pad_h_lo = diff_y // 2
        assert h_up + diff_y == h_out and w_up + diff_x == w_out, (
            "Up: H and W diffs must match (torch.cat would fail otherwise)")
        assert cin1 == c1 + c2
        w1a, w1b = w1[:, :, :c2, :], w1[:, :, c2:, :]
    else:
        c2 = 0
        h_out, w_out = h_up, w_up
        pad_w_lo = pad_h_lo = 0
        assert cin1 == c1
        w1a, w1b = None, w1

    # -- upsample(+pad) operators: numpy constants built at trace time --------
    uh = np.zeros((h_out, h_in), np.float32)
    uh[pad_h_lo:pad_h_lo + h_up, :] = _upsample_matrix(h_up, h_in)
    uw = np.zeros((w_out, w_in), np.float32)
    uw[pad_w_lo:pad_w_lo + w_up, :] = _upsample_matrix(w_up, w_in)
    g = np.kron(uw.T, np.eye(c1, dtype=np.float32))          # (W1*C1, W*C1)

    # -- conv weights -> banded row operators; fold g into the x1 group -------
    t1b = _conv_row_operators(w1b, w_out)                     # (3, W*C1, W*Cout)
    t1bf = jnp.einsum("ij,djo->dio", jnp.asarray(g), t1b)     # (3, W1*C1, W*Cout)
    t2 = _conv_row_operators(w2, w_out)                       # (3, W*Co, W*Co)
    if has_x2:
        t1a = _conv_row_operators(w1a, w_out)                 # (3, W*C2, W*Cout)

    s1, b1 = fold_bn(params["b1"], params["g1"], params["be1"],
                     params["rm1"], params["rv1"])
    s2, b2 = fold_bn(params["b2"], params["g2"], params["be2"],
                     params["rm2"], params["rv2"])
    s1f = jnp.tile(s1, w_out)[None, :].astype(jnp.float32)
    b1f = jnp.tile(b1, w_out)[None, :].astype(jnp.float32)
    s2f = jnp.tile(s2, w_out)[None, :].astype(jnp.float32)
    b2f = jnp.tile(b2, w_out)[None, :].astype(jnp.float32)

    # -- batch blocking & explicit VMEM budget --------------------------------
    b_blk = _pick_batch_block(n, h_out)
    n_lanes = w_out * cout
    act_b = b_blk * (h_in * w_in * c1 + h_out * n_lanes) * 2
    const_b = (h_out * h_in + 3 * w_in * c1 * n_lanes
               + 3 * n_lanes * n_lanes) * 2 + 4 * n_lanes * 4
    if has_x2:
        act_b += b_blk * h_out * w_out * c2 * 2
        const_b += 3 * w_out * c2 * n_lanes * 2
    tmp_b = 10 * b_blk * h_out * n_lanes * 4
    vmem_limit = int(min(max(2 * (act_b + const_b) + tmp_b, 32 << 20), 64 << 20))

    bf16 = jnp.bfloat16
    kernel = _make_up_kernel(has_x2, b_blk, h_out)

    in_specs = [pl.BlockSpec((b_blk, h_in, w_in * c1), lambda i: (i, 0, 0))]
    operands = [x1.astype(bf16)]
    if has_x2:
        in_specs.append(pl.BlockSpec((b_blk, h_out, w_out * c2),
                                     lambda i: (i, 0, 0)))
        operands.append(x2.astype(bf16))
    in_specs.append(pl.BlockSpec((h_out, h_in), lambda i: (0, 0)))
    operands.append(jnp.asarray(uh, bf16))
    if has_x2:
        in_specs.append(pl.BlockSpec((3, w_out * c2, w_out * cout),
                                     lambda i: (0, 0, 0)))
        operands.append(t1a.astype(bf16))
    in_specs += [
        pl.BlockSpec((3, w_in * c1, w_out * cout), lambda i: (0, 0, 0)),
        pl.BlockSpec((1, w_out * cout), lambda i: (0, 0)),
        pl.BlockSpec((1, w_out * cout), lambda i: (0, 0)),
        pl.BlockSpec((3, w_out * cout, w_out * cout), lambda i: (0, 0, 0)),
        pl.BlockSpec((1, w_out * cout), lambda i: (0, 0)),
        pl.BlockSpec((1, w_out * cout), lambda i: (0, 0)),
    ]
    operands += [t1bf.astype(bf16), s1f, b1f, t2.astype(bf16), s2f, b2f]

    out_flat = pl.pallas_call(
        kernel,
        out_shape=jax.ShapeDtypeStruct((n, h_out, w_out * cout), bf16),
        grid_spec=pltpu.PrefetchScalarGridSpec(
            num_scalar_prefetch=0,
            grid=(n // b_blk,),
            in_specs=in_specs,
            out_specs=pl.BlockSpec((b_blk, h_out, w_out * cout),
                                   lambda i: (i, 0, 0)),
        ),
        compiler_params=pltpu.CompilerParams(
            dimension_semantics=("parallel",),
            vmem_limit_bytes=vmem_limit),
    )(*operands)

    out = out_flat.reshape(n, h_out, w_out, cout)
    # NHWC -> NCHW at the module boundary; the f32 cast fuses with the
    # transpose pass (kernel output is bf16 to halve HBM writeback).
    return jnp.transpose(out, (0, 3, 1, 2)).astype(jnp.float32)


# ----------------------------------------------------------------------------
# Pure-JAX reference (for correctness checking only)
# ----------------------------------------------------------------------------
def _upsample_ref(x_nchw):
    """Bilinear x2 upsample, align_corners=True (gather-based; reference only)."""
    n, c, h, w = x_nchw.shape
    ho, wo = 2 * h, 2 * w

    def coords(out_size, in_size):
        if in_size == 1 or out_size == 1:
            z = np.zeros((out_size,), np.int32)
            return np.zeros((out_size,), np.float32), z, z
        src = np.arange(out_size, dtype=np.float32) * (
            (in_size - 1) / (out_size - 1))
        i0 = np.clip(np.floor(src).astype(np.int32), 0, in_size - 2)
        return src - i0, i0, i0 + 1

    fh, h0, h1 = coords(ho, h)
    fw, w0, w1 = coords(wo, w)
    xh = (x_nchw[:, :, h0, :] * (1.0 - fh)[None, None, :, None]
          + x_nchw[:, :, h1, :] * fh[None, None, :, None])
    return xh[:, :, :, w0] * (1.0 - fw) + xh[:, :, :, w1] * fw


def up_reference(params, x1_nchw, x2_nchw=None, eps=1e-5):
    x1 = _upsample_ref(x1_nchw)
    if x2_nchw is not None:
        diff_x = x2_nchw.shape[2] - x1.shape[2]
        diff_y = x2_nchw.shape[3] - x1.shape[3]
        x1 = jnp.pad(x1, ((0, 0), (0, 0),
                          (diff_y // 2, diff_y - diff_y // 2),
                          (diff_x // 2, diff_x - diff_x // 2)))
        x = jnp.concatenate([x2_nchw, x1], axis=1)
    else:
        x = x1

    def conv_bn_relu(x, w, b, g, be, rm, rv):
        y = jax.lax.conv_general_dilated(
            x, w, (1, 1), "SAME",
            dimension_numbers=("NCHW", "HWIO", "NCHW"))
        y = y + b[None, :, None, None]
        y = (y - rm[None, :, None, None]) / jnp.sqrt(rv[None, :, None, None] + eps)
        y = y * g[None, :, None, None] + be[None, :, None, None]
        return jnp.maximum(y, 0.0)

    y = conv_bn_relu(x, params["w1"], params["b1"], params["g1"],
                     params["be1"], params["rm1"], params["rv1"])
    y = conv_bn_relu(y, params["w2"], params["b2"], params["g2"],
                     params["be2"], params["rm2"], params["rv2"])
    return y


if __name__ == "__main__":
    key = jax.random.PRNGKey(0)
    k_p, k_x1, k_x2 = jax.random.split(key, 3)

    in_ch, out_ch = 8, 8
    # x1: low-res features (in_ch//2 channels); x2: skip connection with
    # in_ch//2 channels at 2x spatial resolution (standard UNet usage).
    x1 = jax.random.normal(k_x1, (2, in_ch // 2, 8, 8), jnp.float32)     # NCHW
    x2 = jax.random.normal(k_x2, (2, in_ch // 2, 16, 16), jnp.float32)   # NCHW

    params = init_up_params(k_p, in_ch, out_ch)

    out = up_forward(params, x1, x2)
    jax.block_until_ready(out)
    assert out.shape == (2, out_ch, 16, 16), out.shape
    assert bool(jnp.all(jnp.isfinite(out)))

    # correctness vs. pure-JAX f32 reference (tolerance covers the bf16 MXU
    # operands and the bf16 output writeback used by the kernel).
    ref = up_reference(params, x1, x2)
    err = float(jnp.max(jnp.abs(out - ref)))
    assert err < 1e-1, f"max abs err {err}"

    # Also exercise the dedicated x2=None kernel (no skip-connection group).
    params_ns = init_up_params(k_p, in_ch // 2, out_ch)
    out_ns = up_forward(params_ns, x1)
    jax.block_until_ready(out_ns)
    assert out_ns.shape == (2, out_ch, 16, 16), out_ns.shape
    ref_ns = up_reference(params_ns, x1, None)
    err_ns = float(jnp.max(jnp.abs(out_ns - ref_ns)))
    assert err_ns < 1e-1, f"max abs err (no-skip) {err_ns}"

    print("KERNEL_OK")
</pallas_src>

<mosaic_0001>
module attributes {stable_mosaic.version = 11 : i64} {
  func.func @kernel(%arg0: i32, %arg1: memref<2x8x32xbf16, #tpu.memory_space<vmem>>, %arg2: memref<2x16x64xbf16, #tpu.memory_space<vmem>>, %arg3: memref<16x8xbf16, #tpu.memory_space<vmem>>, %arg4: memref<3x64x128xbf16, #tpu.memory_space<vmem>>, %arg5: memref<3x32x128xbf16, #tpu.memory_space<vmem>>, %arg6: memref<1x128xf32, #tpu.memory_space<vmem>>, %arg7: memref<1x128xf32, #tpu.memory_space<vmem>>, %arg8: memref<3x128x128xbf16, #tpu.memory_space<vmem>>, %arg9: memref<1x128xf32, #tpu.memory_space<vmem>>, %arg10: memref<1x128xf32, #tpu.memory_space<vmem>>, %arg11: memref<2x16x128xbf16, #tpu.memory_space<vmem>>) attributes {dimension_semantics = [#tpu.dimension_semantics<parallel>], iteration_bounds = array<i64: 1>, scalar_prefetch = 0 : i64, scratch_operands = 0 : i64, tpu.core_type = #tpu.core_type<tc>, window_params = [{transform_indices = @transform_0, window_bounds = array<i64: 2, 8, 32>}, {transform_indices = @transform_1, window_bounds = array<i64: 2, 16, 64>}, {pipeline_mode = #tpu.pipeline_mode<synchronous>, transform_indices = @transform_2, window_bounds = array<i64: 16, 8>}, {pipeline_mode = #tpu.pipeline_mode<synchronous>, transform_indices = @transform_3, window_bounds = array<i64: 3, 64, 128>}, {pipeline_mode = #tpu.pipeline_mode<synchronous>, transform_indices = @transform_4, window_bounds = array<i64: 3, 32, 128>}, {pipeline_mode = #tpu.pipeline_mode<synchronous>, transform_indices = @transform_5, window_bounds = array<i64: 1, 128>}, {pipeline_mode = #tpu.pipeline_mode<synchronous>, transform_indices = @transform_6, window_bounds = array<i64: 1, 128>}, {pipeline_mode = #tpu.pipeline_mode<synchronous>, transform_indices = @transform_7, window_bounds = array<i64: 3, 128, 128>}, {pipeline_mode = #tpu.pipeline_mode<synchronous>, transform_indices = @transform_8, window_bounds = array<i64: 1, 128>}, {pipeline_mode = #tpu.pipeline_mode<synchronous>, transform_indices = @transform_9, window_bounds = array<i64: 1, 128>}, {transform_indices = @transform_10, window_bounds = array<i64: 2, 16, 128>}]} {
    %0 = tpu.iota {dimensions = array<i32: 0>} : vector<32x1xi32>
    %c16_i32 = arith.constant 16 : i32
    %c0_i32 = arith.constant 0 : i32
    %1 = arith.cmpi eq, %c16_i32, %c0_i32 : i32
    %c1_i32 = arith.constant 1 : i32
    %2 = arith.select %1, %c1_i32, %c16_i32 : i32
    %3 = vector.broadcast %2 : i32 to vector<32x1xi32>
    %4 = arith.remsi %0, %3 : vector<32x1xi32>
    %c0_i32_0 = arith.constant 0 : i32
    %5 = vector.broadcast %c0_i32_0 : i32 to vector<32x1xi32>
    %6 = arith.cmpi ne, %4, %5 : vector<32x1xi32>
    %c0_i32_1 = arith.constant 0 : i32
    %7 = vector.broadcast %c0_i32_1 : i32 to vector<32x1xi32>
    %8 = arith.cmpi slt, %4, %7 : vector<32x1xi32>
    %c0_i32_2 = arith.constant 0 : i32
    %9 = arith.cmpi slt, %2, %c0_i32_2 : i32
    %10 = vector.broadcast %9 : i1 to vector<32x1xi1>
    %11 = vector.broadcast %10 : vector<32x1xi1> to vector<32x1xi1>
    %12 = arith.xori %8, %11 : vector<32x1xi1>
    %13 = arith.andi %12, %6 : vector<32x1xi1>
    %14 = vector.broadcast %2 : i32 to vector<32x1xi32>
    %15 = arith.addi %4, %14 : vector<32x1xi32>
    %16 = arith.select %13, %15, %4 : vector<32x1xi1>, vector<32x1xi32>
    %c0_i32_3 = arith.constant 0 : i32
    %17 = vector.broadcast %c0_i32_3 : i32 to vector<32x1xi32>
    %18 = arith.cmpi ne, %16, %17 : vector<32x1xi32>
    %c16_i32_4 = arith.constant 16 : i32
    %c0_i32_5 = arith.constant 0 : i32
    %19 = arith.cmpi eq, %c16_i32_4, %c0_i32_5 : i32
    %c1_i32_6 = arith.constant 1 : i32
    %20 = arith.select %19, %c1_i32_6, %c16_i32_4 : i32
    %21 = vector.broadcast %20 : i32 to vector<32x1xi32>
    %22 = arith.remsi %0, %21 : vector<32x1xi32>
    %c0_i32_7 = arith.constant 0 : i32
    %23 = vector.broadcast %c0_i32_7 : i32 to vector<32x1xi32>
    %24 = arith.cmpi ne, %22, %23 : vector<32x1xi32>
    %c0_i32_8 = arith.constant 0 : i32
    %25 = vector.broadcast %c0_i32_8 : i32 to vector<32x1xi32>
    %26 = arith.cmpi slt, %22, %25 : vector<32x1xi32>
    %c0_i32_9 = arith.constant 0 : i32
    %27 = arith.cmpi slt, %20, %c0_i32_9 : i32
    %28 = vector.broadcast %27 : i1 to vector<32x1xi1>
    %29 = vector.broadcast %28 : vector<32x1xi1> to vector<32x1xi1>
    %30 = arith.xori %26, %29 : vector<32x1xi1>
    %31 = arith.andi %30, %24 : vector<32x1xi1>
    %32 = vector.broadcast %20 : i32 to vector<32x1xi32>
    %33 = arith.addi %22, %32 : vector<32x1xi32>
    %34 = arith.select %31, %33, %22 : vector<32x1xi1>, vector<32x1xi32>
    %c15_i32 = arith.constant 15 : i32
    %35 = vector.broadcast %c15_i32 : i32 to vector<32x1xi32>
    %36 = arith.cmpi ne, %34, %35 : vector<32x1xi32>
    %c0 = arith.constant 0 : index
    %c0_10 = arith.constant 0 : index
    %c0_11 = arith.constant 0 : index
    %37 = vector.load %arg1[%c0, %c0_10, %c0_11] : memref<2x8x32xbf16, #tpu.memory_space<vmem>>, vector<2x8x32xbf16>
    %c0_12 = arith.constant 0 : index
    %c0_13 = arith.constant 0 : index
    %38 = vector.load %arg3[%c0_12, %c0_13] : memref<16x8xbf16, #tpu.memory_space<vmem>>, vector<16x8xbf16>
    %39 = vector.shape_cast %38 : vector<16x8xbf16> to vector<1x16x8xbf16>
    %40 = vector.broadcast %39 : vector<1x16x8xbf16> to vector<2x16x8xbf16>
    "tpu.trace_start"() <{level = 10 : i32, message = "boh,bhk->bok"}> : () -> ()
    %cst = arith.constant dense<0.000000e+00> : vector<2x16x32xf32>
    %41 = tpu.matmul %40, %37, %cst {dimension_numbers = #tpu.dot_dimension_numbers<[2], [1], [1], [2], [0, 0, 0, 1, 1, 2], [0], [0]>} : vector<2x16x8xbf16>, vector<2x8x32xbf16>, vector<2x16x32xf32> -> vector<2x16x32xf32>
    "tpu.trace_stop"() : () -> ()
    %42 = arith.truncf %41 : vector<2x16x32xf32> to vector<2x16x32xbf16>
    %43 = vector.shape_cast %42 : vector<2x16x32xbf16> to vector<32x32xbf16>
    %cst_14 = arith.constant 0.000000e+00 : bf16
    %44 = vector.broadcast %cst_14 : bf16 to vector<1x32xbf16>
    %45 = vector.extract_strided_slice %43 {offsets = [0, 0], sizes = [31, 32], strides = [1, 1]} : vector<32x32xbf16> to vector<31x32xbf16>
    %46 = tpu.concatenate %44, %45 in 0 : vector<1x32xbf16>, vector<31x32xbf16> -> vector<32x32xbf16>
    %cst_15 = arith.constant 0.000000e+00 : f32
    %47 = arith.truncf %cst_15 : f32 to bf16
    %48 = vector.shape_cast %18 : vector<32x1xi1> to vector<32x1xi1>
    %49 = vector.broadcast %48 : vector<32x1xi1> to vector<32x32xi1>
    %50 = vector.broadcast %47 : bf16 to vector<32x32xbf16>
    %51 = arith.select %49, %46, %50 : vector<32x32xi1>, vector<32x32xbf16>
    %52 = vector.extract_strided_slice %43 {offsets = [1, 0], sizes = [31, 32], strides = [1, 1]} : vector<32x32xbf16> to vector<31x32xbf16>
    %53 = tpu.concatenate %52, %44 in 0 : vector<31x32xbf16>, vector<1x32xbf16> -> vector<32x32xbf16>
    %cst_16 = arith.constant 0.000000e+00 : f32
    %54 = arith.truncf %cst_16 : f32 to bf16
    %55 = vector.shape_cast %36 : vector<32x1xi1> to vector<32x1xi1>
    %56 = vector.broadcast %55 : vector<32x1xi1> to vector<32x32xi1>
    %57 = vector.broadcast %54 : bf16 to vector<32x32xbf16>
    %58 = arith.select %56, %53, %57 : vector<32x32xi1>, vector<32x32xbf16>
    %c0_17 = arith.constant 0 : index
    %c0_18 = arith.constant 0 : index
    %c0_19 = arith.constant 0 : index
    %59 = vector.load %arg5[%c0_17, %c0_18, %c0_19] : memref<3x32x128xbf16, #tpu.memory_space<vmem>>, vector<1x32x128xbf16>
    %60 = vector.shape_cast %59 : vector<1x32x128xbf16> to vector<32x128xbf16>
    %cst_20 = arith.constant dense<0.000000e+00> : vector<32x128xf32>
    %61 = tpu.matmul %51, %60, %cst_20 {dimension_numbers = #tpu.dot_dimension_numbers<[1], [0], [0], [1], [0, 0, 1, 1], [], []>} : vector<32x32xbf16>, vector<32x128xbf16>, vector<32x128xf32> -> vector<32x128xf32>
    %c1 = arith.constant 1 : index
    %c0_21 = arith.constant 0 : index
    %c0_22 = arith.constant 0 : index
    %62 = vector.load %arg5[%c1, %c0_21, %c0_22] : memref<3x32x128xbf16, #tpu.memory_space<vmem>>, vector<1x32x128xbf16>
    %63 = vector.shape_cast %62 : vector<1x32x128xbf16> to vector<32x128xbf16>
    %cst_23 = arith.constant dense<0.000000e+00> : vector<32x128xf32>
    %64 = tpu.matmul %43, %63, %cst_23 {dimension_numbers = #tpu.dot_dimension_numbers<[1], [0], [0], [1], [0, 0, 1, 1], [], []>} : vector<32x32xbf16>, vector<32x128xbf16>, vector<32x128xf32> -> vector<32x128xf32>
    %65 = arith.addf %61, %64 : vector<32x128xf32>
    %c2 = arith.constant 2 : index
    %c0_24 = arith.constant 0 : index
    %c0_25 = arith.constant 0 : index
    %66 = vector.load %arg5[%c2, %c0_24, %c0_25] : memref<3x32x128xbf16, #tpu.memory_space<vmem>>, vector<1x32x128xbf16>
    %67 = vector.shape_cast %66 : vector<1x32x128xbf16> to vector<32x128xbf16>
    %cst_26 = arith.constant dense<0.000000e+00> : vector<32x128xf32>
    %68 = tpu.matmul %58, %67, %cst_26 {dimension_numbers = #tpu.dot_dimension_numbers<[1], [0], [0], [1], [0, 0, 1, 1], [], []>} : vector<32x32xbf16>, vector<32x128xbf16>, vector<32x128xf32> -> vector<32x128xf32>
    %69 = arith.addf %65, %68 : vector<32x128xf32>
    %c0_27 = arith.constant 0 : index
    %c0_28 = arith.constant 0 : index
    %c0_29 = arith.constant 0 : index
    %70 = vector.load %arg2[%c0_27, %c0_28, %c0_29] : memref<2x16x64xbf16, #tpu.memory_space<vmem>>, vector<2x16x64xbf16>
    %71 = vector.shape_cast %70 : vector<2x16x64xbf16> to vector<32x64xbf16>
    %cst_30 = arith.constant 0.000000e+00 : bf16
    %72 = vector.broadcast %cst_30 : bf16 to vector<1x64xbf16>
    %73 = vector.extract_strided_slice %71 {offsets = [0, 0], sizes = [31, 64], strides = [1, 1]} : vector<32x64xbf16> to vector<31x64xbf16>
    %74 = tpu.concatenate %72, %73 in 0 : vector<1x64xbf16>, vector<31x64xbf16> -> vector<32x64xbf16>
    %cst_31 = arith.constant 0.000000e+00 : f32
    %75 = arith.truncf %cst_31 : f32 to bf16
    %76 = vector.shape_cast %18 : vector<32x1xi1> to vector<32x1xi1>
    %77 = vector.broadcast %76 : vector<32x1xi1> to vector<32x64xi1>
    %78 = vector.broadcast %75 : bf16 to vector<32x64xbf16>
    %79 = arith.select %77, %74, %78 : vector<32x64xi1>, vector<32x64xbf16>
    %80 = vector.extract_strided_slice %71 {offsets = [1, 0], sizes = [31, 64], strides = [1, 1]} : vector<32x64xbf16> to vector<31x64xbf16>
    %81 = tpu.concatenate %80, %72 in 0 : vector<31x64xbf16>, vector<1x64xbf16> -> vector<32x64xbf16>
    %cst_32 = arith.constant 0.000000e+00 : f32
    %82 = arith.truncf %cst_32 : f32 to bf16
    %83 = vector.shape_cast %36 : vector<32x1xi1> to vector<32x1xi1>
    %84 = vector.broadcast %83 : vector<32x1xi1> to vector<32x64xi1>
    %85 = vector.broadcast %82 : bf16 to vector<32x64xbf16>
    %86 = arith.select %84, %81, %85 : vector<32x64xi1>, vector<32x64xbf16>
    %c0_33 = arith.constant 0 : index
    %c0_34 = arith.constant 0 : index
    %c0_35 = arith.constant 0 : index
    %87 = vector.load %arg4[%c0_33, %c0_34, %c0_35] : memref<3x64x128xbf16, #tpu.memory_space<vmem>>, vector<1x64x128xbf16>
    %88 = vector.shape_cast %87 : vector<1x64x128xbf16> to vector<64x128xbf16>
    %cst_36 = arith.constant dense<0.000000e+00> : vector<32x128xf32>
    %89 = tpu.matmul %79, %88, %cst_36 {dimension_numbers = #tpu.dot_dimension_numbers<[1], [0], [0], [1], [0, 0, 1, 1], [], []>} : vector<32x64xbf16>, vector<64x128xbf16>, vector<32x128xf32> -> vector<32x128xf32>
    %c1_37 = arith.constant 1 : index
    %c0_38 = arith.constant 0 : index
    %c0_39 = arith.constant 0 : index
    %90 = vector.load %arg4[%c1_37, %c0_38, %c0_39] : memref<3x64x128xbf16, #tpu.memory_space<vmem>>, vector<1x64x128xbf16>
    %91 = vector.shape_cast %90 : vector<1x64x128xbf16> to vector<64x128xbf16>
    %cst_40 = arith.constant dense<0.000000e+00> : vector<32x128xf32>
    %92 = tpu.matmul %71, %91, %cst_40 {dimension_numbers = #tpu.dot_dimension_numbers<[1], [0], [0], [1], [0, 0, 1, 1], [], []>} : vector<32x64xbf16>, vector<64x128xbf16>, vector<32x128xf32> -> vector<32x128xf32>
    %93 = arith.addf %89, %92 : vector<32x128xf32>
    %c2_41 = arith.constant 2 : index
    %c0_42 = arith.constant 0 : index
    %c0_43 = arith.constant 0 : index
    %94 = vector.load %arg4[%c2_41, %c0_42, %c0_43] : memref<3x64x128xbf16, #tpu.memory_space<vmem>>, vector<1x64x128xbf16>
    %95 = vector.shape_cast %94 : vector<1x64x128xbf16> to vector<64x128xbf16>
    %cst_44 = arith.constant dense<0.000000e+00> : vector<32x128xf32>
    %96 = tpu.matmul %86, %95, %cst_44 {dimension_numbers = #tpu.dot_dimension_numbers<[1], [0], [0], [1], [0, 0, 1, 1], [], []>} : vector<32x64xbf16>, vector<64x128xbf16>, vector<32x128xf32> -> vector<32x128xf32>
    %97 = arith.addf %93, %96 : vector<32x128xf32>
    %98 = arith.addf %69, %97 : vector<32x128xf32>
    %c0_45 = arith.constant 0 : index
    %c0_46 = arith.constant 0 : index
    %99 = vector.load %arg6[%c0_45, %c0_46] : memref<1x128xf32, #tpu.memory_space<vmem>>, vector<1x128xf32>
    %100 = vector.broadcast %99 : vector<1x128xf32> to vector<32x128xf32>
    %101 = arith.mulf %98, %100 : vector<32x128xf32>
    %c0_47 = arith.constant 0 : index
    %c0_48 = arith.constant 0 : index
    %102 = vector.load %arg7[%c0_47, %c0_48] : memref<1x128xf32, #tpu.memory_space<vmem>>, vector<1x128xf32>
    %103 = vector.broadcast %102 : vector<1x128xf32> to vector<32x128xf32>
    %104 = arith.addf %101, %103 : vector<32x128xf32>
    %cst_49 = arith.constant 0.000000e+00 : f32
    %105 = vector.broadcast %cst_49 : f32 to vector<32x128xf32>
    %106 = arith.maximumf %104, %105 : vector<32x128xf32>
    %107 = arith.truncf %106 : vector<32x128xf32> to vector<32x128xbf16>
    %cst_50 = arith.constant 0.000000e+00 : bf16
    %108 = vector.broadcast %cst_50 : bf16 to vector<1x128xbf16>
    %109 = vector.extract_strided_slice %107 {offsets = [0, 0], sizes = [31, 128], strides = [1, 1]} : vector<32x128xbf16> to vector<31x128xbf16>
    %110 = tpu.concatenate %108, %109 in 0 : vector<1x128xbf16>, vector<31x128xbf16> -> vector<32x128xbf16>
    %cst_51 = arith.constant 0.000000e+00 : f32
    %111 = arith.truncf %cst_51 : f32 to bf16
    %112 = vector.shape_cast %18 : vector<32x1xi1> to vector<32x1xi1>
    %113 = vector.broadcast %112 : vector<32x1xi1> to vector<32x128xi1>
    %114 = vector.broadcast %111 : bf16 to vector<32x128xbf16>
    %115 = arith.select %113, %110, %114 : vector<32x128xi1>, vector<32x128xbf16>
    %116 = vector.extract_strided_slice %107 {offsets = [1, 0], sizes = [31, 128], strides = [1, 1]} : vector<32x128xbf16> to vector<31x128xbf16>
    %117 = tpu.concatenate %116, %108 in 0 : vector<31x128xbf16>, vector<1x128xbf16> -> vector<32x128xbf16>
    %cst_52 = arith.constant 0.000000e+00 : f32
    %118 = arith.truncf %cst_52 : f32 to bf16
    %119 = vector.shape_cast %36 : vector<32x1xi1> to vector<32x1xi1>
    %120 = vector.broadcast %119 : vector<32x1xi1> to vector<32x128xi1>
    %121 = vector.broadcast %118 : bf16 to vector<32x128xbf16>
    %122 = arith.select %120, %117, %121 : vector<32x128xi1>, vector<32x128xbf16>
    %c0_53 = arith.constant 0 : index
    %c0_54 = arith.constant 0 : index
    %c0_55 = arith.constant 0 : index
    %123 = vector.load %arg8[%c0_53, %c0_54, %c0_55] : memref<3x128x128xbf16, #tpu.memory_space<vmem>>, vector<1x128x128xbf16>
    %124 = vector.shape_cast %123 : vector<1x128x128xbf16> to vector<128x128xbf16>
    %cst_56 = arith.constant dense<0.000000e+00> : vector<32x128xf32>
    %125 = tpu.matmul %115, %124, %cst_56 {dimension_numbers = #tpu.dot_dimension_numbers<[1], [0], [0], [1], [0, 0, 1, 1], [], []>} : vector<32x128xbf16>, vector<128x128xbf16>, vector<32x128xf32> -> vector<32x128xf32>
    %c1_57 = arith.constant 1 : index
    %c0_58 = arith.constant 0 : index
    %c0_59 = arith.constant 0 : index
    %126 = vector.load %arg8[%c1_57, %c0_58, %c0_59] : memref<3x128x128xbf16, #tpu.memory_space<vmem>>, vector<1x128x128xbf16>
    %127 = vector.shape_cast %126 : vector<1x128x128xbf16> to vector<128x128xbf16>
    %cst_60 = arith.constant dense<0.000000e+00> : vector<32x128xf32>
    %128 = tpu.matmul %107, %127, %cst_60 {dimension_numbers = #tpu.dot_dimension_numbers<[1], [0], [0], [1], [0, 0, 1, 1], [], []>} : vector<32x128xbf16>, vector<128x128xbf16>, vector<32x128xf32> -> vector<32x128xf32>
    %129 = arith.addf %125, %128 : vector<32x128xf32>
    %c2_61 = arith.constant 2 : index
    %c0_62 = arith.constant 0 : index
    %c0_63 = arith.constant 0 : index
    %130 = vector.load %arg8[%c2_61, %c0_62, %c0_63] : memref<3x128x128xbf16, #tpu.memory_space<vmem>>, vector<1x128x128xbf16>
    %131 = vector.shape_cast %130 : vector<1x128x128xbf16> to vector<128x128xbf16>
    %cst_64 = arith.constant dense<0.000000e+00> : vector<32x128xf32>
    %132 = tpu.matmul %122, %131, %cst_64 {dimension_numbers = #tpu.dot_dimension_numbers<[1], [0], [0], [1], [0, 0, 1, 1], [], []>} : vector<32x128xbf16>, vector<128x128xbf16>, vector<32x128xf32> -> vector<32x128xf32>
    %133 = arith.addf %129, %132 : vector<32x128xf32>
    %c0_65 = arith.constant 0 : index
    %c0_66 = arith.constant 0 : index
    %134 = vector.load %arg9[%c0_65, %c0_66] : memref<1x128xf32, #tpu.memory_space<vmem>>, vector<1x128xf32>
    %135 = vector.broadcast %134 : vector<1x128xf32> to vector<32x128xf32>
    %136 = arith.mulf %133, %135 : vector<32x128xf32>
    %c0_67 = arith.constant 0 : index
    %c0_68 = arith.constant 0 : index
    %137 = vector.load %arg10[%c0_67, %c0_68] : memref<1x128xf32, #tpu.memory_space<vmem>>, vector<1x128xf32>
    %138 = vector.broadcast %137 : vector<1x128xf32> to vector<32x128xf32>
    %139 = arith.addf %136, %138 : vector<32x128xf32>
    %cst_69 = arith.constant 0.000000e+00 : f32
    %140 = vector.broadcast %cst_69 : f32 to vector<32x128xf32>
    %141 = arith.maximumf %139, %140 : vector<32x128xf32>
    %142 = arith.truncf %141 : vector<32x128xf32> to vector<32x128xbf16>
    %143 = vector.shape_cast %142 : vector<32x128xbf16> to vector<2x16x128xbf16>
    %c0_70 = arith.constant 0 : index
    %c0_71 = arith.constant 0 : index
    %c0_72 = arith.constant 0 : index
    %144 = vector.load %arg11[%c0_70, %c0_71, %c0_72] : memref<2x16x128xbf16, #tpu.memory_space<vmem>>, vector<2x16x128xbf16>
    tpu.vector_store %arg11[%c0_70, %c0_71, %c0_72], %143 {strides = array<i32>} : memref<2x16x128xbf16, #tpu.memory_space<vmem>>, vector<2x16x128xbf16>,
    return
  }
  func.func @transform_0(%arg0: i32) -> (i32, i32, i32) {
    %c0_i32 = arith.constant 0 : i32
    %c0_i32_0 = arith.constant 0 : i32
    %c0_i32_1 = arith.constant 0 : i32
    return %arg0, %c0_i32, %c0_i32_0 : i32, i32, i32
  }
  func.func @transform_1(%arg0: i32) -> (i32, i32, i32) {
    %c0_i32 = arith.constant 0 : i32
    %c0_i32_0 = arith.constant 0 : i32
    %c0_i32_1 = arith.constant 0 : i32
    return %arg0, %c0_i32, %c0_i32_0 : i32, i32, i32
  }
  func.func @transform_2(%arg0: i32) -> (i32, i32) {
    %c0_i32 = arith.constant 0 : i32
    %c0_i32_0 = arith.constant 0 : i32
    %c0_i32_1 = arith.constant 0 : i32
    return %c0_i32, %c0_i32_0 : i32, i32
  }
  func.func @transform_3(%arg0: i32) -> (i32, i32, i32) {
    %c0_i32 = arith.constant 0 : i32
    %c0_i32_0 = arith.constant 0 : i32
    %c0_i32_1 = arith.constant 0 : i32
    %c0_i32_2 = arith.constant 0 : i32
    return %c0_i32, %c0_i32_0, %c0_i32_1 : i32, i32, i32
  }
  func.func @transform_4(%arg0: i32) -> (i32, i32, i32) {
    %c0_i32 = arith.constant 0 : i32
    %c0_i32_0 = arith.constant 0 : i32
    %c0_i32_1 = arith.constant 0 : i32
    %c0_i32_2 = arith.constant 0 : i32
    return %c0_i32, %c0_i32_0, %c0_i32_1 : i32, i32, i32
  }
  func.func @transform_5(%arg0: i32) -> (i32, i32) {
    %c0_i32 = arith.constant 0 : i32
    %c0_i32_0 = arith.constant 0 : i32
    %c0_i32_1 = arith.constant 0 : i32
    return %c0_i32, %c0_i32_0 : i32, i32
  }
  func.func @transform_6(%arg0: i32) -> (i32, i32) {
    %c0_i32 = arith.constant 0 : i32
    %c0_i32_0 = arith.constant 0 : i32
    %c0_i32_1 = arith.constant 0 : i32
    return %c0_i32, %c0_i32_0 : i32, i32
  }
  func.func @transform_7(%arg0: i32) -> (i32, i32, i32) {
    %c0_i32 = arith.constant 0 : i32
    %c0_i32_0 = arith.constant 0 : i32
    %c0_i32_1 = arith.constant 0 : i32
    %c0_i32_2 = arith.constant 0 : i32
    return %c0_i32, %c0_i32_0, %c0_i32_1 : i32, i32, i32
  }
  func.func @transform_8(%arg0: i32) -> (i32, i32) {
    %c0_i32 = arith.constant 0 : i32
    %c0_i32_0 = arith.constant 0 : i32
    %c0_i32_1 = arith.constant 0 : i32
    return %c0_i32, %c0_i32_0 : i32, i32
  }
  func.func @transform_9(%arg0: i32) -> (i32, i32) {
    %c0_i32 = arith.constant 0 : i32
    %c0_i32_0 = arith.constant 0 : i32
    %c0_i32_1 = arith.constant 0 : i32
    return %c0_i32, %c0_i32_0 : i32, i32
  }
  func.func @transform_10(%arg0: i32) -> (i32, i32, i32) {
    %c0_i32 = arith.constant 0 : i32
    %c0_i32_0 = arith.constant 0 : i32
    %c0_i32_1 = arith.constant 0 : i32
    return %arg0, %c0_i32, %c0_i32_0 : i32, i32, i32
  }
}

</mosaic_0001>

<bundles_post_ra>
// kernel: tile.23
= control target key start
LH: loop header
LB: loop body
LE: loop exit
PB: predicated region body
PF: predicated region fallthrough
CT: control target
= control target key end

     0   :  { %s28_s0 = inlined_call_operand.vmem [shape: f32[8], index: 0, kind: input, shape index: {}]   ;;  %s29_s1 = inlined_call_operand.vmem [shape: f32[16,8], index: 1, kind: output, shape index: {}]  }
   0x1   :  { %v4_v0 = vld [vmem:[%s28_s0] ss:$0 sm:$0xff] }
   0x2   :  { %5 = vst [vmem:[%s29_s1] sm:$0xff] %v4_v0 }
   0x3   :  { %8 = vst [vmem:[%s29_s1 + $0x8] sm:$0xff] %v4_v0 }

// kernel: tile.24
= control target key start
LH: loop header
LB: loop body
LE: loop exit
PB: predicated region body
PF: predicated region fallthrough
CT: control target
= control target key end

     0   :  { %s131_s10 = smov 120   ;;  %s132_s11 = smov 104   ;;  %vm3_vm0 = vcmask 64512   ;;  %vm9_vm1 = vcmask 1048512   ;;  %vm15_vm2 = vcmask 982912   ;;  %vm21_vm3 = vcmask 917312   ;;  %s207_s0 = inlined_call_operand.vmem [shape: f32[16,8], index: 0, kind: input, shape index: {}]   ;;  %s208_s1 = inlined_call_operand.vmem [shape: f32[1,128], index: 1, kind: output, shape index: {}]  }
   0x1   :  { %v101_v0 = vld [vmem:[%s207_s0 + $0xf] sm:$0x1]   ;;  %v103_v1 = vld [vmem:[%s207_s0 + $0xd] sm:$0x1]   ;;  %v105_v2 = vld [vmem:[%s207_s0 + $0xb] sm:$0x1]  }
   0x2   :  { %7 = vrot.lane.b32.xlu0 %v101_v0, %s131_s10  ;;  %19 = vrot.lane.b32.xlu1 %v103_v1, %s132_s11  ;;  %s133_s14 = smov 88   ;;  %v102_v3 = vld [vmem:[%s207_s0 + $0xe] sm:$0x1]   ;;  %v104_v4 = vld [vmem:[%s207_s0 + $0xc] sm:$0x1]   ;;  %s134_s19 = smov 112  }
   0x3   :  { %31 = vrot.lane.b32.xlu2 %v105_v2, %s133_s14  ;;  %s135_s20 = smov 96   ;;  %v106_v5 = vld [vmem:[%s207_s0 + $0xa] sm:$0x1]   ;;  %s136_s23 = smov 80   ;;  %v107_v6 = vld [vmem:[%s207_s0 + $0x9] sm:$0x1]  }
   0x4   :  { %v108_v7 = vld [vmem:[%s207_s0 + $0x8] sm:$0x1]   ;;  %s137_s28 = smov 72   ;;  %s138_s29 = smov 64   ;;  %v109_v8 = vld [vmem:[%s207_s0 + $0x7] sm:$0x1]  }
   0x5   :  { %s139_s3 = smov 56   ;;  %v110_v9 = vld [vmem:[%s207_s0 + $0x6] sm:$0x1]   ;;  %v111_v10 = vld [vmem:[%s207_s0 + $0x5] sm:$0x1]   ;;  %s140_s8 = smov 48  }
   0x6   :  { %s141_s9 = smov 40   ;;  %v112_v11 = vld [vmem:[%s207_s0 + $0x4] sm:$0x1]   ;;  %s142_s12 = smov 32   ;;  %v113_v12 = vld [vmem:[%s207_s0 + $0x3] sm:$0x1]  }
   0x7   :  { %v114_v13 = vld [vmem:[%s207_s0 + $0x2] sm:$0x1]   ;;  %s143_s17 = smov 24   ;;  %s144_s18 = smov 16   ;;  %v115_v14 = vld [vmem:[%s207_s0 + $0x1] sm:$0x1]  }
   0x8   :  { %s145_s21 = smov 8   ;;  %v2_v15 = vld [vmem:[%s207_s0] sm:$0x1]   ;;  %vm27_vm4 = vcmask 851712   ;;  %vm33_vm5 = vcmask 786112   ;;  %vm39_vm6 = vcmask 720512  }
   0x9   :  { %4 = vst.msk [vmem:[#allocation0] sm:$0x1] %vm3_vm0, %v2_v15   ;;  %vm45_vm7 = vcmask 654912   ;;  %vm51_vm8 = vcmask 589312   ;;  %vm57_vm9 = vcmask 523712   ;;  %vm63_vm10 = vcmask 458112  }
   0xa   :  { %13 = vrot.lane.b32.xlu0 %v102_v3, %s134_s19  ;;  %25 = vrot.lane.b32.xlu1 %v104_v4, %s135_s20  ;;  %vm69_vm11 = vcmask 392512   ;;  %vm75_vm12 = vcmask 326912   ;;  %vm81_vm13 = vcmask 261312   ;;  %vm87_vm14 = vcmask 195712  }
   0xb   :  { %37 = vrot.lane.b32.xlu2 %v106_v5, %s136_s23  ;;  %vm93_vm15 = vcmask 130112  }
  0x12   :  { %43 = vrot.lane.b32.xlu0 %v107_v6, %s137_s28  ;;  %49 = vrot.lane.b32.xlu1 %v108_v7, %s138_s29 }
  0x13   :  { %55 = vrot.lane.b32.xlu2 %v109_v8, %s139_s3 }
  0x1a   :  { %61 = vrot.lane.b32.xlu0 %v110_v9, %s140_s8  ;;  %67 = vrot.lane.b32.xlu1 %v111_v10, %s141_s9 }
  0x1b   :  { %73 = vrot.lane.b32.xlu2 %v112_v11, %s142_s12 }
  0x22   :  { %79 = vrot.lane.b32.xlu0 %v113_v12, %s143_s17  ;;  %85 = vrot.lane.b32.xlu1 %v114_v13, %s144_s18 }
  0x23   :  { %91 = vrot.lane.b32.xlu2 %v115_v14, %s145_s21 }
  0x5d   :  { %v32_v16 = vpop.permute.xlu2 %31  }
  0x65   :  { %v38_v17 = vpop.permute.xlu2 %37  }
  0x6d   :  { %v56_v18 = vpop.permute.xlu2 %55  }
  0x74   :  { %v8_v19 = vpop.permute.xlu0 %7   ;;  %v20_v20 = vpop.permute.xlu1 %19  }
  0x75   :  { %10 = vst.msk [vmem:[#allocation0] sm:$0x1] %vm9_vm1, %v8_v19   ;;  %v74_v21 = vpop.permute.xlu2 %73  }
  0x7c   :  { %v14_v22 = vpop.permute.xlu0 %13   ;;  %v26_v23 = vpop.permute.xlu1 %25  }
  0x7d   :  { %16 = vst.msk [vmem:[#allocation0] sm:$0x1] %vm15_vm2, %v14_v22   ;;  %v92_v24 = vpop.permute.xlu2 %91  }
  0x7e   :  { %22 = vst.msk [vmem:[#allocation0] sm:$0x1] %vm21_vm3, %v20_v20  }
  0x7f   :  { %28 = vst.msk [vmem:[#allocation0] sm:$0x1] %vm27_vm4, %v26_v23  }
  0x80   :  { %34 = vst.msk [vmem:[#allocation0] sm:$0x1] %vm33_vm5, %v32_v16  }
  0x81   :  { %40 = vst.msk [vmem:[#allocation0] sm:$0x1] %vm39_vm6, %v38_v17  }
  0x84   :  { %v44_v25 = vpop.permute.xlu0 %43   ;;  %v50_v26 = vpop.permute.xlu1 %49  }
  0x85   :  { %46 = vst.msk [vmem:[#allocation0] sm:$0x1] %vm45_vm7, %v44_v25  }
  0x86   :  { %52 = vst.msk [vmem:[#allocation0] sm:$0x1] %vm51_vm8, %v50_v26  }
  0x87   :  { %58 = vst.msk [vmem:[#allocation0] sm:$0x1] %vm57_vm9, %v56_v18  }
  0x8c   :  { %v62_v27 = vpop.permute.xlu0 %61   ;;  %v68_v28 = vpop.permute.xlu1 %67  }
  0x8d   :  { %64 = vst.msk [vmem:[#allocation0] sm:$0x1] %vm63_vm10, %v62_v27  }
  0x8e   :  { %70 = vst.msk [vmem:[#allocation0] sm:$0x1] %vm69_vm11, %v68_v28  }
  0x8f   :  { %76 = vst.msk [vmem:[#allocation0] sm:$0x1] %vm75_vm12, %v74_v21  }
  0x94   :  { %v80_v29 = vpop.permute.xlu0 %79   ;;  %v86_v30 = vpop.permute.xlu1 %85  }
  0x95   :  { %82 = vst.msk [vmem:[#allocation0] sm:$0x1] %vm81_vm13, %v80_v29  }
  0x96   :  { %88 = vst.msk [vmem:[#allocation0] sm:$0x1] %vm87_vm14, %v86_v30  }
  0x97   :  { %94 = vst.msk [vmem:[#allocation0] sm:$0x1] %vm93_vm15, %v92_v24  }
  0x9e   :  { %v97_v31 = vld [vmem:[#allocation0] sm:$0x1] }
  0x9f   :  { %100 = vst [vmem:[%s208_s1] sm:$0x1] %v97_v31 }

// kernel: up_forward.1
= control target key start
LH: loop header
LB: loop body
LE: loop exit
PB: predicated region body
PF: predicated region fallthrough
CT: control target
= control target key end

     0   :  { %vm112_vm0 = vcmask 1043456   ;;  %vm108_vm1 = vcmask 64512   ;;  %v38_v8 = vlaneseq  ;;  %vm1296_vm3 = vmmov 1   ;;  %s1678_s0 = inlined_call_operand.vmem [shape: bf16[2,8,32], index: 0, kind: input, shape index: {}]   ;;  %s1679_s2 = inlined_call_operand.vmem [shape: bf16[16,8], index: 2, kind: input, shape index: {}]   ;;  %s1680_s4 = inlined_call_operand.vmem [shape: bf16[3,32,128], index: 4, kind: input, shape index: {}]   ;;  %s1681_s3 = inlined_call_operand.vmem [shape: bf16[3,64,128], index: 3, kind: input, shape index: {}]   ;;  %s1682_s1 = inlined_call_operand.vmem [shape: bf16[2,16,64], index: 1, kind: input, shape index: {}]   ;;  %s1683_s5 = inlined_call_operand.vmem [shape: f32[1,128], index: 5, kind: input, shape index: {}]   ;;  %s1684_s6 = inlined_call_operand.vmem [shape: f32[1,128], index: 6, kind: input, shape index: {}]   ;;  %s1685_s7 = inlined_call_operand.vmem [shape: bf16[3,128,128], index: 7, kind: input, shape index: {}]   ;;  %s1686_s8 = inlined_call_operand.vmem [shape: f32[1,128], index: 8, kind: input, shape index: {}]   ;;  %s1687_s9 = inlined_call_operand.vmem [shape: f32[1,128], index: 9, kind: input, shape index: {}]   ;;  %s1688_s10 = inlined_call_operand.vmem [shape: bf16[2,16,128], index: 10, kind: output, shape index: {}]  }
   0x1   :  { %v99_v0 = vld [vmem:[%s1678_s0] sm:$0xf]  ;;  %v100_v1 = vld [vmem:[%s1678_s0 + $0x4] sm:$0xf]  ;;  %v1236_v5 = vld [vmem:[%s1680_s4 + $0x18] sm:$0xff]  ;;  %v1297_v20 = vmov 0  }
   0x2   :  { %v114_v2 = vsel %vm112_vm0, %v99_v0, 0  ;;  %v131_v3 = vsel %vm112_vm0, %v100_v1, 0  ;;  %v1232_v4 = vld [vmem:[%s1679_s2] sm:$0xff]  ;;  %301 = vmatpush.bf16.msra.mxu2 %v1236_v5  ;;  %1288 = vmatpush.bf16.msra.mxu3 %v1236_v5  ;;  %v1235_v6 = vld [vmem:[%s1680_s4 + $0x10] sm:$0xff]  ;;  %v1238_v7 = vld [vmem:[%s1680_s4 + $0x28] sm:$0xff]  ;;  %v39_v12 = vshrl.u32 %v38_v8, 7  ;;  %v1409_v42 = vunpack.c.l.b16 %v1297_v20 }
   0x3   :  { %123 = vmatpush.bf16.msra.mxu0 %v114_v2  ;;  %140 = vmatpush.bf16.msra.mxu1 %v131_v3  ;;  %v1234_v9 = vld [vmem:[%s1680_s4 + $0x8] sm:$0xff]  ;;  %v1237_v10 = vld [vmem:[%s1680_s4 + $0x20] sm:$0xff]  ;;  %v1244_v15 = vld [vmem:[%s1681_s3 + $0x18] sm:$0xff]  ;;  %vm290_vm8 = vcmask 261120   ;;  %v1412_v43 = vunpack.c.h.b16 %v1297_v20  ;;  %vm220_vm12 = vsmask.f32 7424 }
   0x4   :  { %v1233_v11 = vld [vmem:[%s1680_s4] sm:$0xff]  ;;  %v40_v13 = vadd.s32 8, %v39_v12  ;;  %vm191_vm4 = vmpackc.low %vm1296_vm3, %vm1296_vm3  ;;  %v47_v18 = vand.u32 15, %v39_v12  ;;  %v42_v23 = vadd.s32 24, %v39_v12  ;;  %v1243_v26 = vld [vmem:[%s1681_s3 + $0x10] sm:$0xff]  ;;  %v41_v50 = vadd.s32 16, %v39_v12 }
   0x5   :  { %v195_v21 = vsel %vm191_vm4, 65537, %v1297_v20  ;;  %v1248_v27 = vld [vmem:[%s1681_s3 + $0x38] sm:$0xff]  ;;  %v1242_v35 = vld [vmem:[%s1681_s3 + $0x8] sm:$0xff]  ;;  %v1404_v40 = vld [vmem:[%s1682_s1] sm:$0xff]  ;;  %vm161_vm15 = vsmask.f32 256 }
   0x6   :  { %978 = vmatmul.msk.bf16.vlgmr.msra.gmra.mxu0 %vm108_vm1, %v1232_v4  ;;  %979 = vmatmul.msk.bf16.vlgmr.msra.gmra.mxu1 %vm108_vm1, %v1232_v4  ;;  %v54_v14 = vand.u32 15, %v40_v13  ;;  %vm1385_vm6 = vcmp.ne.s32.totalorder %v47_v18, 0  ;;  %v199_v30 = vunpack.c.l.b16 %v195_v21  ;;  %v68_v36 = vand.u32 15, %v42_v23  ;;  %v1252_v45 = vld [vmem:[%s1681_s3 + $0x58] sm:$0xff]  ;;  %v1247_v51 = vld [vmem:[%s1681_s3 + $0x30] sm:$0xff]  ;;  %v1241_v56 = vld [vmem:[%s1681_s3] sm:$0xff] }
   0x7   :  { %302 = vmatpush.bf16.msra.mxu2 %v1235_v6  ;;  %1289 = vmatpush.bf16.msra.mxu3 %v1235_v6  ;;  %vm190_vm7 = vmpackc.low %vm1385_vm6, %vm1385_vm6  ;;  %v412_v49 = vshrl.u32 %v1404_v40, 16  ;;  %v1251_v58 = vld [vmem:[%s1681_s3 + $0x50] sm:$0xff]  ;;  %v1246_v59 = vld [vmem:[%s1681_s3 + $0x28] sm:$0xff]  ;;  %v415_v62 = vshll.u32 %v1404_v40, 16  ;;  %v61_v3 = vand.u32 15, %v41_v50  ;;  %vm179_vm0 = vcmask 1040384  }
   0x8   :  { %380 = vmatpush.bf16.msrb.mxu0 %v1238_v7  ;;  %vm96_vm2 = vcmp.ne.s32.totalorder %v54_v14, 15  ;;  %491 = vmatpush.bf16.msrb.mxu1 %v1248_v27  ;;  %v1406_v41 = vunpack.i.l.s16 %v199_v30  ;;  %v194_v48 = vsel %vm190_vm7, 65537, %v1297_v20  ;;  %vm1428_vm9 = vcmp.ne.s32.totalorder %v68_v36, 15  ;;  %v1250_v5 = vld [vmem:[%s1681_s3 + $0x48] sm:$0xff]  ;;  %v1245_v6 = vld [vmem:[%s1681_s3 + $0x20] sm:$0xff] }
   0x9   :  { %vm240_vm5 = vmpackc.low %vm96_vm2, %vm96_vm2  ;;  %v198_v57 = vunpack.c.l.b16 %v194_v48  ;;  %v1446_v61 = vrot.slane %v412_v49, 7  ;;  %vm1475_vm1 = vcmp.ne.s32.totalorder %v61_v3, 0  ;;  %vm482_vm6 = vcmask 523264  }
   0xa   :  { %v244_v22 = vsel %vm240_vm5, 65537, %v1297_v20  ;;  %vm257_vm10 = vcmp.ne.s32.totalorder %v1406_v41, %v1409_v42  ;;  %vm242_vm13 = vmpackc.low %vm1428_vm9, %vm1428_vm9  ;;  %vm209_vm4 = vcmp.ne.s32.totalorder %v1406_v41, %v1412_v43  ;;  %vm228_vm9 = vcmask 1047552  }
   0xb   :  { %338 = vmatpush.bf16.msrb.mxu3 %v1234_v9  ;;  %540 = vmatpush.bf16.msrb.mxu2 %v1244_v15  ;;  %v248_v31 = vunpack.c.l.b16 %v244_v22  ;;  %v980_v4 = vunpack.i.l.s16 %v198_v57  ;;  %v246_v8 = vsel %vm242_vm13, 65537, %v1297_v20  ;;  %v417_v9 = vor.u32 %v415_v62, %v1446_v61  ;;  %vm1480_vm2 = vmand %vm179_vm0, %vm161_vm15  ;;  %v1249_v15 = vld [vmem:[%s1681_s3 + $0x40] sm:$0xff]  ;;  %v1260_v57 = vld [vmem:[%s1685_s7 + $0x38] sm:$0xff] }
   0xc   :  { %381 = vmatpush.bf16.msrb.mxu0 %v1237_v10  ;;  %492 = vmatpush.bf16.msrb.mxu1 %v1247_v51  ;;  %v250_v14 = vunpack.c.l.b16 %v246_v8  ;;  %vm192_vm5 = vmpackc.low %vm1475_vm1, %vm1475_vm1  ;;  %v1275_v8 = vld [vmem:[%s1685_s7 + $0xb0] sm:$0xff] }
   0xd   :  { %v985_v44 = vunpack.i.l.s16 %v248_v31  ;;  %vm208_vm3 = vcmp.ne.s32.totalorder %v980_v4, %v1409_v42  ;;  %v1276_v4 = vld [vmem:[%s1685_s7 + $0xb8] sm:$0xff] }
   0xe   :  { %vm1500_vm7 = vmpackc.low %vm209_vm4, %vm208_vm3  ;;  %v987_v21 = vunpack.i.l.s16 %v250_v14  ;;  %v1274_v14 = vld [vmem:[%s1685_s7 + $0xa8] sm:$0xff] }
   0xf   :  { %339 = vmatpush.bf16.msrb.mxu3 %v1233_v11  ;;  %541 = vmatpush.bf16.msrb.mxu2 %v1243_v26  ;;  %vm258_vm11 = vcmp.ne.s32.totalorder %v985_v44, %v1412_v43  ;;  %v1294_v44 = vld [vmem:[%s1686_s8] ss:$0 sm:$0xff] }
  0x10   :  { %vm1457_vm14 = vmpackc.low %vm258_vm11, %vm257_vm10  ;;  %493 = vmatpush.bf16.msrb.mxu1 %v1246_v59  ;;  %vm265_vm13 = vcmp.ne.s32.totalorder %v987_v21, %v1412_v43  ;;  %v1265_v59 = vld [vmem:[%s1685_s7 + $0x60] sm:$0xff] }
  0x11   :  { %vm1518_vm11 = vmand %vm228_vm9, %vm220_vm12  ;;  %v1253_v21 = vld [vmem:[%s1685_s7] sm:$0xff] }
  0x12   :  { %vm1528_vm0 = vmpackc.low %vm265_vm13, %vm257_vm10 }
  0x13   :  { %542 = vmatpush.bf16.msrb.mxu2 %v1242_v35 }
  0x14   :  { %494 = vmatpush.bf16.msrb.mxu1 %v1245_v6  ;;  %v1262_v6 = vld [vmem:[%s1685_s7 + $0x48] sm:$0xff] }
  0x17   :  { %543 = vmatpush.bf16.msrb.mxu2 %v1241_v56  ;;  %1058 = vmatmul.msk.bf16.vlgmr.msrb.gmra.mxu1 %vm482_vm6, %v1404_v40  ;;  %v1266_v56 = vld [vmem:[%s1685_s7 + $0x68] sm:$0xff] }
  0x18   :  { %835 = vmatpush.bf16.msra.mxu1 %v1260_v57 }
  0x83   :  { %v125_v16 = vpop.f32.mrf.mxu0  ;;  %v142_v17 = vpop.f32.mrf.mxu1 }
  0x84   :  { %v147_v19 = vpack.c.bf16 %v125_v16, %v125_v16  ;;  %v149_v24 = vpack.c.bf16 %v142_v17, %v142_v17  ;;  %v428_v16 = vsel %vm1480_vm2, 0, %v417_v9  ;;  %v1261_v9 = vld [vmem:[%s1685_s7 + $0x40] sm:$0xff] }
  0x85   :  { %v429_v22 = vsel %vm1500_vm7, %v428_v16, 0  ;;  %v1254_v16 = vld [vmem:[%s1685_s7 + $0x8] sm:$0xff] }
  0x86   :  { %v155_v32 = vunpack.c.l.b16 %v147_v19  ;;  %v157_v37 = vunpack.c.l.b16 %v149_v24  ;;  %v1240_v19 = vld [vmem:[%s1682_s1 + $0x8] sm:$0xff]  ;;  %v196_v24 = vsel %vm192_vm5, 65537, %v1297_v20 }
  0x87   :  { %v419_v25 = vshrl.u32 %v1240_v19, 16  ;;  %1059 = vmatmul.msk.bf16.gmra.mxu1 %vm482_vm6, %v1240_v19 }
  0x89   :  { %v421_v30 = vrot.slane %v419_v25, 7 }
  0x8b   :  { %v127_v28 = vpop.f32.mrf.mxu0  ;;  %v144_v29 = vpop.f32.mrf.mxu1 }
  0x8c   :  { %v148_v33 = vpack.c.bf16 %v127_v28, %v127_v28  ;;  %v150_v34 = vpack.c.bf16 %v144_v29, %v144_v29  ;;  %v200_v29 = vunpack.c.l.b16 %v196_v24  ;;  %v1272_v24 = vld [vmem:[%s1685_s7 + $0x98] sm:$0xff]  ;;  %v1295_v28 = vld [vmem:[%s1687_s9] ss:$0 sm:$0xff] }
  0x8e   :  { %v156_v38 = vunpack.c.l.b16 %v148_v33  ;;  %v158_v39 = vunpack.c.l.b16 %v150_v34  ;;  %v422_v33 = vshll.u32 %v1240_v19, 16  ;;  %v982_v34 = vunpack.i.l.s16 %v200_v29  ;;  %v1273_v19 = vld [vmem:[%s1685_s7 + $0xa0] sm:$0xff] }
  0x90   :  { %v159_v46 = vpack.c.b16 %v156_v38, %v155_v32  ;;  %v1417_v47 = vpack.c.b16 %v158_v39, %v157_v37  ;;  %v424_v35 = vor.u32 %v422_v33, %v421_v30  ;;  %vm215_vm1 = vcmp.ne.s32.totalorder %v982_v34, %v1409_v42 }
  0x91   :  { %vm1544_vm10 = vmpackc.low %vm209_vm4, %vm215_vm1  ;;  %v433_v43 = vrot.slane %v422_v33, 1 }
  0x92   :  { %v163_v52 = vshrl.u32 %v159_v46, 16  ;;  %v166_v53 = vshll.u32 %v159_v46, 16  ;;  %v173_v54 = vshll.u32 %v1417_v47, 16  ;;  %1000 = vmatmul.msk.bf16.vlgmr.msra.gmra.mxu2 %vm290_vm8, %v159_v46  ;;  %1001 = vmatmul.msk.bf16.vlgmr.msra.gmra.mxu3 %vm290_vm8, %v1417_v47  ;;  %v170_v23 = vshrl.u32 %v1417_v47, 16 }
  0x93   :  { %598 = vmatpush.bf16.msra.mxu3 %v1252_v45  ;;  %v425_v38 = vsel %vm161_vm15, %v1446_v61, %v424_v35  ;;  %v431_v46 = vrot.slane %v415_v62, 1  ;;  %v435_v50 = vor.u32 %v433_v43, %v419_v25  ;;  %v1264_v62 = vld [vmem:[%s1685_s7 + $0x58] sm:$0xff]  ;;  %919 = vmatpush.bf16.msra.mxu2 %v1276_v4  ;;  %v1270_v35 = vld [vmem:[%s1685_s7 + $0x88] sm:$0xff] }
  0x94   :  { %v221_v60 = vrot.slane %v166_v53, 1  ;;  %v223_v0 = vrot.slane %v173_v54, 1  ;;  %v165_v2 = vrot.slane %v163_v52, 7  ;;  %v172_v31 = vrot.slane %v170_v23, 7 }
  0x95   :  { %v430_v45 = vsel %vm1544_vm10, %v425_v38, 0  ;;  %v432_v41 = vor.u32 %v431_v46, %v412_v49  ;;  %v438_v51 = vsel %vm1518_vm11, %v435_v50, 0  ;;  %v1268_v49 = vld [vmem:[%s1685_s7 + $0x78] sm:$0xff]  ;;  %v1293_v38 = vld [vmem:[%s1684_s6] ss:$0 sm:$0xff] }
  0x96   :  { %v222_v63 = vor.u32 %v221_v60, %v163_v52  ;;  %v168_v11 = vor.u32 %v166_v53, %v165_v2  ;;  %v225_v27 = vor.u32 %v223_v0, %v170_v23  ;;  %v175_v37 = vor.u32 %v173_v54, %v172_v31  ;;  %768 = vmatpush.bf16.msra.mxu0 %v1268_v49  ;;  %v1267_v54 = vld [vmem:[%s1685_s7 + $0x70] sm:$0xff]  ;;  %v1292_v31 = vld [vmem:[%s1683_s5] ss:$0 sm:$0xff] }
  0x97   :  { %599 = vmatpush.bf16.msra.mxu3 %v1251_v58  ;;  %v434_v47 = vsel %vm220_vm12, %v432_v41, %v433_v43  ;;  %v440_v52 = vsel %vm1528_vm0, %v438_v51, 0  ;;  %v1259_v60 = vld [vmem:[%s1685_s7 + $0x30] sm:$0xff]  ;;  %920 = vmatpush.bf16.msra.mxu2 %v1275_v8  ;;  %v1269_v43 = vld [vmem:[%s1685_s7 + $0x80] sm:$0xff] }
  0x98   :  { %v224_v7 = vsel %vm220_vm12, %v222_v63, %v223_v0  ;;  %v181_v17 = vsel %vm1480_vm2, 0, %v168_v11  ;;  %v230_v20 = vsel %vm1518_vm11, %v225_v27, 0  ;;  %v176_v39 = vsel %vm161_vm15, %v165_v2, %v175_v37  ;;  %836 = vmatpush.bf16.msra.mxu1 %v1259_v60  ;;  %v1258_v63 = vld [vmem:[%s1685_s7 + $0x28] sm:$0xff]  ;;  %v1263_v0 = vld [vmem:[%s1685_s7 + $0x50] sm:$0xff]  ;;  %v1257_v2 = vld [vmem:[%s1685_s7 + $0x20] sm:$0xff]  ;;  %v496_v11 = vpop.f32.mrf.mxu1 }
  0x99   :  { %v267_v10 = vsel %vm1457_vm14, %v224_v7, 0  ;;  %v218_v26 = vsel %vm1500_vm7, %v181_v17, 0  ;;  %v268_v36 = vsel %vm1528_vm0, %v230_v20, 0  ;;  %v219_v42 = vsel %vm1544_vm10, %v176_v39, 0  ;;  %v1256_v7 = vld [vmem:[%s1685_s7 + $0x18] sm:$0xff]  ;;  %v1271_v20 = vld [vmem:[%s1685_s7 + $0x90] sm:$0xff] }
  0x9a   :  { %1024 = vmatmul.msk.bf16.vlgmr.msrb.gmra.mxu0 %vm290_vm8, %v267_v10  ;;  %v439_v48 = vsel %vm1457_vm14, %v434_v47, 0  ;;  %v1255_v10 = vld [vmem:[%s1685_s7 + $0x10] sm:$0xff] }
  0x9b   :  { %600 = vmatpush.bf16.msra.mxu3 %v1250_v5  ;;  %769 = vmatpush.bf16.msra.mxu0 %v1267_v54 }
  0x9c   :  { %837 = vmatpush.bf16.msra.mxu1 %v1258_v63  ;;  %921 = vmatpush.bf16.msra.mxu2 %v1274_v14 }
  0x9f   :  { %601 = vmatpush.bf16.msra.mxu3 %v1249_v15  ;;  %770 = vmatpush.bf16.msra.mxu0 %v1266_v56 }
  0xa0   :  { %838 = vmatpush.bf16.msra.mxu1 %v1257_v2  ;;  %922 = vmatpush.bf16.msra.mxu2 %v1273_v19  ;;  %v498_v25 = vpop.f32.mrf.mxu1 }
  0xa2   :  { %1010 = vmatmul.msk.bf16.vlgmr.msrb.gmra.mxu3 %vm290_vm8, %v218_v26  ;;  %1076 = vmatmul.msk.bf16.vlgmr.msrb.gmra.mxu2 %vm482_vm6, %v429_v22 }
  0xa3   :  { %771 = vmatpush.bf16.msra.mxu0 %v1265_v59 }
  0xa4   :  { %839 = vmatpush.bf16.msra.mxu1 %v1256_v7  ;;  %923 = vmatpush.bf16.msra.mxu2 %v1272_v24 }
  0xa7   :  { %772 = vmatpush.bf16.msra.mxu0 %v1264_v62 }
  0xa8   :  { %840 = vmatpush.bf16.msra.mxu1 %v1255_v10  ;;  %924 = vmatpush.bf16.msra.mxu2 %v1271_v20 }
  0xaa   :  { %1025 = vmatmul.msk.bf16.gmra.mxu0 %vm290_vm8, %v268_v36 }
  0xab   :  { %773 = vmatpush.bf16.msra.mxu0 %v1263_v0 }
  0xac   :  { %841 = vmatpush.bf16.msra.mxu1 %v1254_v16  ;;  %925 = vmatpush.bf16.msra.mxu2 %v1270_v35 }
  0xaf   :  { %774 = vmatpush.bf16.msra.mxu0 %v1262_v6 }
  0xb0   :  { %842 = vmatpush.bf16.msra.mxu1 %v1253_v21  ;;  %926 = vmatpush.bf16.msra.mxu2 %v1269_v43 }
  0xb2   :  { %1011 = vmatmul.msk.bf16.gmra.mxu3 %vm290_vm8, %v219_v42  ;;  %1077 = vmatmul.msk.bf16.gmra.mxu2 %vm482_vm6, %v430_v45 }
  0xb3   :  { %775 = vmatpush.bf16.msra.mxu0 %v1261_v9 }
  0xc2   :  { %1102 = vmatmul.msk.bf16.vlgmr.msra.gmra.mxu3 %vm482_vm6, %v439_v48 }
  0xd2   :  { %1103 = vmatmul.msk.bf16.gmra.mxu3 %vm482_vm6, %v440_v52 }
 0x104   :  { %v501_v47 = vpop.f32.mrf.mxu1 }
 0x10c   :  { %v503_v0 = vpop.f32.mrf.mxu1 }
 0x115   :  { %v1568_v53 = vpop.f32.mrf.mxu3  ;;  %v304_v58 = vpop.f32.mrf.mxu2 }
 0x117   :  { %v383_v17 = vpop.f32.mrf.mxu0 }
 0x11d   :  { %v1570_v40 = vpop.f32.mrf.mxu3  ;;  %v306_v3 = vpop.f32.mrf.mxu2 }
 0x11f   :  { %v385_v34 = vpop.f32.mrf.mxu0 }
 0x125   :  { %v341_v55 = vpop.f32.mrf.mxu3  ;;  %v545_v12 = vpop.f32.mrf.mxu2 }
 0x126   :  { %v342_v22 = vadd.f32 %v341_v55, %v304_v58  ;;  %v546_v23 = vadd.f32 %v545_v12, %v496_v11 }
 0x127   :  { %v388_v55 = vpop.f32.mrf.mxu0 }
 0x128   :  { %v393_v29 = vadd.f32 %v383_v17, %v342_v22 }
 0x12d   :  { %v343_v61 = vpop.f32.mrf.mxu3  ;;  %v547_v26 = vpop.f32.mrf.mxu2 }
 0x12e   :  { %v344_v36 = vadd.f32 %v343_v61, %v306_v3  ;;  %v548_v39 = vadd.f32 %v547_v26, %v498_v25 }
 0x12f   :  { %v390_v8 = vpop.f32.mrf.mxu0 }
 0x130   :  { %v394_v42 = vadd.f32 %v385_v34, %v344_v36 }
 0x135   :  { %v346_v5 = vpop.f32.mrf.mxu3  ;;  %v550_v48 = vpop.f32.mrf.mxu2 }
 0x136   :  { %v347_v51 = vadd.f32 %v346_v5, %v1568_v53  ;;  %v551_v49 = vadd.f32 %v550_v48, %v501_v47 }
 0x138   :  { %v395_v58 = vadd.f32 %v388_v55, %v347_v51 }
 0x13d   :  { %v348_v15 = vpop.f32.mrf.mxu3  ;;  %v552_v2 = vpop.f32.mrf.mxu2 }
 0x13e   :  { %v349_v3 = vadd.f32 %v348_v15, %v1570_v40  ;;  %v553_v53 = vadd.f32 %v552_v2, %v503_v0 }
 0x140   :  { %v396_v10 = vadd.f32 %v390_v8, %v349_v3 }
 0x145   :  { %v603_v27 = vpop.f32.mrf.mxu3 }
 0x146   :  { %v613_v30 = vadd.f32 %v603_v27, %v546_v23 }
 0x148   :  { %v617_v33 = vadd.f32 %v613_v30, %v393_v29 }
 0x14a   :  { %v625_v37 = vmul.f32 %v1292_v31, %v617_v33 }
 0x14c   :  { %v633_v46 = vadd.f32 %v1293_v38, %v625_v37 }
 0x14d   :  { %v605_v45 = vpop.f32.mrf.mxu3 }
 0x14e   :  { %v614_v41 = vadd.f32 %v605_v45, %v548_v39  ;;  %v637_v52 = vmax.f32 %v633_v46, 0.0 }
 0x150   :  { %v618_v50 = vadd.f32 %v614_v41, %v394_v42  ;;  %v641_v59 = vpack.c.bf16 %v637_v52, %v637_v52 }
 0x152   :  { %v626_v54 = vmul.f32 %v1292_v31, %v618_v50  ;;  %v649_v4 = vunpack.c.l.b16 %v641_v59 }
 0x154   :  { %v634_v56 = vadd.f32 %v1293_v38, %v626_v54 }
 0x155   :  { %v608_v57 = vpop.f32.mrf.mxu3 }
 0x156   :  { %v638_v60 = vmax.f32 %v634_v56, 0.0  ;;  %v615_v61 = vadd.f32 %v608_v57, %v551_v49 }
 0x158   :  { %v642_v62 = vpack.c.bf16 %v638_v60, %v638_v60  ;;  %v619_v63 = vadd.f32 %v615_v61, %v395_v58 }
 0x15a   :  { %v650_v6 = vunpack.c.l.b16 %v642_v62  ;;  %v627_v7 = vmul.f32 %v1292_v31, %v619_v63 }
 0x15c   :  { %v653_v5 = vpack.c.b16 %v650_v6, %v649_v4  ;;  %v635_v11 = vadd.f32 %v1293_v38, %v627_v7 }
 0x15d   :  { %v610_v9 = vpop.f32.mrf.mxu3 }
 0x15e   :  { %v616_v12 = vadd.f32 %v610_v9, %v553_v53  ;;  %776 = vmatmul.bf16.vlgmr.msra.gmra.mxu0 %v653_v5  ;;  %v656_v14 = vshrl.u32 %v653_v5, 16  ;;  %v659_v19 = vshll.u32 %v653_v5, 16  ;;  %v639_v23 = vmax.f32 %v635_v11, 0.0 }
 0x160   :  { %v620_v16 = vadd.f32 %v616_v12, %v396_v10  ;;  %v658_v17 = vrot.slane %v656_v14, 7  ;;  %v643_v26 = vpack.c.bf16 %v639_v23, %v639_v23  ;;  %v675_v20 = vrot.slane %v659_v19, 1 }
 0x162   :  { %v628_v21 = vmul.f32 %v1292_v31, %v620_v16  ;;  %v661_v22 = vor.u32 %v659_v19, %v658_v17  ;;  %v651_v29 = vunpack.c.l.b16 %v643_v26  ;;  %v676_v31 = vor.u32 %v675_v20, %v656_v14 }
 0x164   :  { %v636_v24 = vadd.f32 %v1293_v38, %v628_v21  ;;  %v672_v40 = vsel %vm1480_vm2, 0, %v661_v22 }
 0x165   :  { %v673_v15 = vsel %vm1500_vm7, %v672_v40, 0 }
 0x166   :  { %843 = vmatmul.bf16.vlgmr.msra.gmra.mxu1 %v673_v15  ;;  %v640_v25 = vmax.f32 %v636_v24, 0.0 }
 0x168   :  { %v644_v27 = vpack.c.bf16 %v640_v25, %v640_v25 }
 0x16a   :  { %v652_v30 = vunpack.c.l.b16 %v644_v27 }
 0x16c   :  { %v654_v33 = vpack.c.b16 %v652_v30, %v651_v29 }
 0x16e   :  { %v663_v34 = vshrl.u32 %v654_v33, 16  ;;  %v666_v35 = vshll.u32 %v654_v33, 16  ;;  %781 = vmatmul.bf16.gmra.mxu0 %v654_v33 }
 0x170   :  { %v677_v36 = vrot.slane %v666_v35, 1  ;;  %v665_v37 = vrot.slane %v663_v34, 7 }
 0x172   :  { %v678_v13 = vsel %vm220_vm12, %v676_v31, %v677_v36  ;;  %v668_v38 = vor.u32 %v666_v35, %v665_v37  ;;  %v679_v42 = vor.u32 %v677_v36, %v663_v34 }
 0x173   :  { %v683_v18 = vsel %vm1457_vm14, %v678_v13, 0 }
 0x174   :  { %927 = vmatmul.bf16.vlgmr.msra.gmra.mxu2 %v683_v18  ;;  %v669_v39 = vsel %vm161_vm15, %v658_v17, %v668_v38  ;;  %v682_v46 = vsel %vm1518_vm11, %v679_v42, 0 }
 0x175   :  { %v674_v45 = vsel %vm1544_vm10, %v669_v39, 0  ;;  %v684_v41 = vsel %vm1528_vm0, %v682_v46, 0 }
 0x176   :  { %848 = vmatmul.bf16.gmra.mxu1 %v674_v45 }
 0x184   :  { %932 = vmatmul.bf16.gmra.mxu2 %v684_v41 }
 0x1db   :  { %v777_v47 = vpop.f32.mrf.mxu0 }
 0x1e3   :  { %v844_v43 = vpop.f32.mrf.mxu1  ;;  %v779_v51 = vpop.f32.mrf.mxu0 }
 0x1e4   :  { %v845_v50 = vadd.f32 %v844_v43, %v777_v47 }
 0x1eb   :  { %v846_v48 = vpop.f32.mrf.mxu1  ;;  %v782_v59 = vpop.f32.mrf.mxu0 }
 0x1ec   :  { %v847_v49 = vadd.f32 %v846_v48, %v779_v51 }
 0x1f3   :  { %v849_v56 = vpop.f32.mrf.mxu1  ;;  %v784_v6 = vpop.f32.mrf.mxu0 }
 0x1f4   :  { %v850_v0 = vadd.f32 %v849_v56, %v782_v59 }
 0x1f7   :  { %v928_v1 = vpop.f32.mrf.mxu2 }
 0x1f8   :  { %v938_v52 = vadd.f32 %v928_v1, %v845_v50 }
 0x1fa   :  { %v946_v54 = vmul.f32 %v1294_v44, %v938_v52 }
 0x1fb   :  { %v851_v4 = vpop.f32.mrf.mxu1 }
 0x1fc   :  { %v954_v57 = vadd.f32 %v1295_v28, %v946_v54  ;;  %v852_v7 = vadd.f32 %v851_v4, %v784_v6 }
 0x1fe   :  { %v958_v61 = vmax.f32 %v954_v57, 0.0 }
 0x1ff   :  { %v930_v32 = vpop.f32.mrf.mxu2 }
 0x200   :  { %v939_v55 = vadd.f32 %v930_v32, %v847_v49 }
 0x202   :  { %v947_v58 = vmul.f32 %v1294_v44, %v939_v55 }
 0x204   :  { %v955_v60 = vadd.f32 %v1295_v28, %v947_v58 }
 0x206   :  { %v959_v62 = vmax.f32 %v955_v60, 0.0 }
 0x207   :  { %v933_v63 = vpop.f32.mrf.mxu2 }
 0x208   :  { %v1280_v2 = vpack.c.bf16 %v959_v62, %v958_v61  ;;  %v940_v3 = vadd.f32 %v933_v63, %v850_v0 }
 0x20a   :  { %1281 = vst [vmem:[%s1688_s10] sm:$0xff] %v1280_v2   ;;  %v948_v53 = vmul.f32 %v1294_v44, %v940_v3 }
 0x20c   :  { %v956_v9 = vadd.f32 %v1295_v28, %v948_v53 }
 0x20e   :  { %v960_v12 = vmax.f32 %v956_v9, 0.0 }
 0x20f   :  { %v935_v5 = vpop.f32.mrf.mxu2 }
 0x210   :  { %v941_v8 = vadd.f32 %v935_v5, %v852_v7 }
 0x212   :  { %v949_v10 = vmul.f32 %v1294_v44, %v941_v8 }
 0x214   :  { %v957_v11 = vadd.f32 %v1295_v28, %v949_v10 }
 0x216   :  { %v961_v14 = vmax.f32 %v957_v11, 0.0 }
 0x218   :  { %v1285_v16 = vpack.c.bf16 %v961_v14, %v960_v12 }
 0x21a   :  { %1287 = vst [vmem:[%s1688_s10 + $0x8] sm:$0xff] %v1285_v16  }

</bundles_post_ra>
